<compile_context>
chip_gen: v6e
topology: v6e:2x2x1
jax: 0.10.0
libtpu: 0.0.40
codegen_flags: <defaults>
</compile_context>

<pallas_src>
import functools

import jax
import jax.numpy as jnp
from jax.experimental import pallas as pl
from jax.experimental.pallas import tpu as pltpu


# ----------------------------------------------------------------------------
# GELU helper (shared by both kernels).  `h` arrives as f32.
# ----------------------------------------------------------------------------
def _gelu(h, approximate_gelu, low_precision_gelu, lp_dtype):
    if approximate_gelu:
        # tanh approximation -> EUP slot.  Optionally run in the low-precision
        # compute dtype (bf16 on v6e/v7x) since the result is downcast for fc2
        # anyway.
        if low_precision_gelu:
            h = h.astype(lp_dtype)
        half = jnp.asarray(0.5, h.dtype)
        one = jnp.asarray(1.0, h.dtype)
        c0 = jnp.asarray(0.7978845608028654, h.dtype)
        c1 = jnp.asarray(0.044715, h.dtype)
        return half * h * (one + jnp.tanh(c0 * (h + c1 * h * h * h)))
    # Exact erf form (torch.nn.functional.gelu default).  Kept in f32: it is a
    # long f32 polynomial regardless and keeps the f32 reference check tight.
    return 0.5 * h * (1.0 + jax.lax.erf(h * 0.7071067811865476))


# ----------------------------------------------------------------------------
# Primary kernel: weights fully resident in VMEM, 1-D grid over row tiles.
# ----------------------------------------------------------------------------
def _mlp_kernel_resident(x_ref, w1_ref, b1_ref, w2_ref, b2_ref, o_ref, *,
                         approximate_gelu, low_precision_gelu):
    # x_ref: (tm, D)   w1_ref: (D, H)   b1_ref: (1, H)
    # w2_ref: (H, D)   b2_ref: (1, D)   o_ref: (tm, D)
    x = x_ref[...]

    # fc1 + b1, f32 accumulation on the MXU.
    h = jnp.dot(x, w1_ref[...], preferred_element_type=jnp.float32)
    h = h + b1_ref[...].astype(jnp.float32)

    h = _gelu(h, approximate_gelu, low_precision_gelu, w2_ref.dtype)
    # dropout: identity in inference mode.

    # fc2 (+ b2), f32 accumulation; downcast GELU output to W2 dtype so the
    # MXU stays in bf16 when bf16 weights are passed.
    out = jnp.dot(h.astype(w2_ref.dtype), w2_ref[...],
                  preferred_element_type=jnp.float32)
    out = out + b2_ref[...].astype(jnp.float32)

    # dropout: identity in inference mode.
    o_ref[...] = out.astype(o_ref.dtype)


# ----------------------------------------------------------------------------
# Fallback kernel: H streamed in slabs (only when weights cannot be resident).
# ----------------------------------------------------------------------------
def _mlp_kernel_slab(x_ref, w1_ref, b1_ref, w2_ref, b2_ref, o_ref, acc_ref, *,
                     approximate_gelu, low_precision_gelu):
    # x_ref: (tm, D)   w1_ref: (D, th)   b1_ref: (1, th)
    # w2_ref: (th, D)  b2_ref: (1, D)    o_ref: (tm, D)   acc_ref: (tm, D) f32
    h_idx = pl.program_id(1)

    @pl.when(h_idx == 0)
    def _():
        # Fold b2 into the accumulator init (broadcast, no zeros pass).
        acc_ref[...] = jnp.broadcast_to(b2_ref[...].astype(jnp.float32),
                                        acc_ref.shape)

    h = jnp.dot(x_ref[...], w1_ref[...], preferred_element_type=jnp.float32)
    h = h + b1_ref[...].astype(jnp.float32)

    # GELU is elementwise in H, so applying it per H-slab is exact.
    h = _gelu(h, approximate_gelu, low_precision_gelu, w2_ref.dtype)

    # fc2 partial, accumulated into the resident f32 scratch.
    acc_ref[...] += jnp.dot(h.astype(w2_ref.dtype), w2_ref[...],
                            preferred_element_type=jnp.float32)

    @pl.when(h_idx == pl.num_programs(1) - 1)
    def _():
        # dropout: identity in inference mode.
        o_ref[...] = acc_ref[...].astype(o_ref.dtype)


# ----------------------------------------------------------------------------
# Host-side helpers.
# ----------------------------------------------------------------------------
def _round_up(x, m):
    return (x + m - 1) // m * m


def _vmem_cap_bytes():
    """75% of the chip's physical VMEM (48 MiB v7x, 96 MiB v5e/v6e)."""
    try:
        cap = int(pltpu.get_tpu_info().vmem_capacity_bytes)
    except Exception:
        cap = 64 << 20  # conservative default == v7x per-TC capacity
    return max(int(0.75 * cap), 32 << 20)


def _largest_aligned_divisor(n, target, align):
    """Largest d <= target with d % align == 0 and n % d == 0, else None."""
    d = (min(target, n) // align) * align
    while d >= align:
        if n % d == 0:
            return d
        d -= align
    return None


@functools.partial(jax.jit,
                   static_argnames=("tile_m", "tile_h", "approximate_gelu"))
def mlp_forward(x, w1, b1, w2, b2, *, tile_m=512, tile_h=1024,
                approximate_gelu=False):
    """Inference-mode ViT MLP.  x: (B, S, D) -> (B, S, D)."""
    B, S, D = x.shape
    H = w1.shape[1]
    M = B * S

    xb = jnp.dtype(x.dtype).itemsize
    wb = jnp.dtype(w1.dtype).itemsize
    ob = xb  # output dtype == input dtype
    low_precision_gelu = wb < 4  # bf16 / fp8 weights -> bf16 GELU (tanh path)

    cap = _vmem_cap_bytes()

    # ---- row-tile selection -------------------------------------------------
    # Sublane packing: 8 for f32, 16 for bf16, 32 for int8/fp8.
    packing = 8 * max(1, 4 // xb)
    tile_m_req = int(tile_m)
    if M >= 512:
        # Keep >= 2 row tiles so the "parallel" axis can shard across v7x's
        # two TensorCores; 256-aligned to fill the 256-wide MXU on v6e/v7x.
        tile_m_req = min(tile_m_req, _round_up(pl.cdiv(M, 2), 256))
    tile_m_eff = _round_up(min(tile_m_req, M), packing)
    M_pad = _round_up(M, tile_m_eff)
    n_m = M_pad // tile_m_eff

    # ---- reshape / pad ------------------------------------------------------
    x2d = x.reshape(M, D)
    if M_pad != M:
        x2d = jnp.pad(x2d, ((0, M_pad - M), (0, 0)))
    b1_2d = b1.reshape(1, H)
    b2_2d = b2.reshape(1, D)

    # ---- VMEM footprints ----------------------------------------------------
    io_bytes = 2 * tile_m_eff * D * xb + 2 * tile_m_eff * D * ob  # x/out, 2-buf
    resident_w_bytes = (2 * D * H + H + D) * wb                    # single copy
    inter_bytes = tile_m_eff * H * 4                               # f32 (tm, H)
    resident_fp = resident_w_bytes + io_bytes + inter_bytes

    use_resident = resident_fp <= int(0.85 * cap)

    kernel_kwargs = dict(approximate_gelu=approximate_gelu,
                         low_precision_gelu=low_precision_gelu)

    if use_resident:
        # -------------------- resident-weight path ---------------------------
        vmem_limit = min(cap, max(int(resident_fp * 1.4), 32 << 20))
        cost = pl.CostEstimate(
            flops=4 * M_pad * D * H,
            transcendentals=M_pad * H,
            bytes_accessed=(M_pad * D * xb + M_pad * D * ob
                            + (2 * D * H + H + D) * wb))  # weights read ONCE

        out2d = pl.pallas_call(
            functools.partial(_mlp_kernel_resident, **kernel_kwargs),
            out_shape=jax.ShapeDtypeStruct((M_pad, D), x.dtype),
            grid_spec=pltpu.PrefetchScalarGridSpec(
                num_scalar_prefetch=0,
                grid=(n_m,),
                in_specs=[
                    pl.BlockSpec((tile_m_eff, D), lambda i: (i, 0)),
                    # Weights/biases: constant index_map + single-buffered ->
                    # one HBM read total, half the VMEM of default 2-buffering.
                    pl.BlockSpec((D, H), lambda i: (0, 0),
                                 pipeline_mode=pl.Buffered(1)),
                    pl.BlockSpec((1, H), lambda i: (0, 0),
                                 pipeline_mode=pl.Buffered(1)),
                    pl.BlockSpec((H, D), lambda i: (0, 0),
                                 pipeline_mode=pl.Buffered(1)),
                    pl.BlockSpec((1, D), lambda i: (0, 0),
                                 pipeline_mode=pl.Buffered(1)),
                ],
                out_specs=pl.BlockSpec((tile_m_eff, D), lambda i: (i, 0)),
            ),
            compiler_params=pltpu.CompilerParams(
                dimension_semantics=("parallel",),
                vmem_limit_bytes=vmem_limit),
            cost_estimate=cost,
        )(x2d, w1, b1_2d, w2, b2_2d)

    else:
        # -------------------- H-slab streaming fallback ----------------------
        # Hidden tile: largest 128-multiple divisor of H not above the request.
        tile_h_eff = _largest_aligned_divisor(H, int(tile_h), 128)
        if tile_h_eff is None:
            tile_h_eff = H  # H not 128-divisible; footprint checked below.
        n_h = H // tile_h_eff

        slab_fp = (2 * (D * tile_h_eff + tile_h_eff * D) * wb   # W slabs, 2-buf
                   + 2 * (tile_h_eff + D) * wb                  # biases
                   + io_bytes
                   + tile_m_eff * D * 4                         # f32 acc scratch
                   + tile_m_eff * tile_h_eff * 4)               # f32 (tm, th)
        if slab_fp > cap:
            raise ValueError(
                f"MLP kernel: slab footprint {slab_fp} B exceeds VMEM cap "
                f"{cap} B; reduce tile_m/tile_h.")
        vmem_limit = min(cap, max(int(slab_fp * 1.4), 32 << 20))
        cost = pl.CostEstimate(
            flops=4 * M_pad * D * H,
            transcendentals=M_pad * H,
            # Weights are re-streamed once per row tile in this design.
            bytes_accessed=(M_pad * D * xb + M_pad * D * ob
                            + n_m * (2 * D * H + H) * wb + D * wb))

        out2d = pl.pallas_call(
            functools.partial(_mlp_kernel_slab, **kernel_kwargs),
            out_shape=jax.ShapeDtypeStruct((M_pad, D), x.dtype),
            grid_spec=pltpu.PrefetchScalarGridSpec(
                num_scalar_prefetch=0,
                grid=(n_m, n_h),
                in_specs=[
                    pl.BlockSpec((tile_m_eff, D), lambda i, h: (i, 0)),
                    pl.BlockSpec((D, tile_h_eff), lambda i, h: (0, h)),
                    pl.BlockSpec((1, tile_h_eff), lambda i, h: (0, h)),
                    pl.BlockSpec((tile_h_eff, D), lambda i, h: (h, 0)),
                    pl.BlockSpec((1, D), lambda i, h: (0, 0)),
                ],
                out_specs=pl.BlockSpec((tile_m_eff, D), lambda i, h: (i, 0)),
                scratch_shapes=[pltpu.VMEM((tile_m_eff, D), jnp.float32)],
            ),
            compiler_params=pltpu.CompilerParams(
                dimension_semantics=("parallel", "arbitrary"),
                vmem_limit_bytes=vmem_limit),
            cost_estimate=cost,
        )(x2d, w1, b1_2d, w2, b2_2d)

    return out2d[:M].reshape(B, S, D)


def mlp_reference(x, w1, b1, w2, b2):
    h = jnp.dot(x, w1) + b1
    h = 0.5 * h * (1.0 + jax.lax.erf(h / jnp.sqrt(2.0)))
    return jnp.dot(h, w2) + b2


if __name__ == "__main__":
    # Small shapes consistent with the module: tokens (batch=2, seq=8),
    # in_features=32, hidden_features=64.  dropRate ignored (eval mode).
    B, S, D, H = 2, 8, 32, 64

    key = jax.random.PRNGKey(0)
    kx, kw1, kb1, kw2, kb2 = jax.random.split(key, 5)

    x = jax.random.normal(kx, (B, S, D), dtype=jnp.float32)
    # "Linear" params stored already transposed: (in, out).
    w1 = jax.random.normal(kw1, (D, H), dtype=jnp.float32) * 0.02
    b1 = jax.random.normal(kb1, (H,), dtype=jnp.float32) * 0.01
    w2 = jax.random.normal(kw2, (H, D), dtype=jnp.float32) * 0.02
    b2 = jax.random.normal(kb2, (D,), dtype=jnp.float32) * 0.01

    # f32 path — bit-for-bit semantics check vs. the pure-JAX reference.
    out = jax.block_until_ready(mlp_forward(x, w1, b1, w2, b2))
    ref = mlp_reference(x, w1, b1, w2, b2)
    assert out.shape == (B, S, D)
    assert jnp.allclose(out, ref, atol=1e-5, rtol=1e-5), "f32 mismatch vs ref"

    # bf16 weights/activations path (v6e/v7x recommendation), f32 accumulation.
    out_bf16 = jax.block_until_ready(
        mlp_forward(x.astype(jnp.bfloat16), w1.astype(jnp.bfloat16),
                    b1.astype(jnp.bfloat16), w2.astype(jnp.bfloat16),
                    b2.astype(jnp.bfloat16)))
    assert out_bf16.shape == (B, S, D)
    assert jnp.allclose(out_bf16.astype(jnp.float32), ref,
                        atol=1e-2, rtol=1e-2), "bf16 mismatch vs ref"

    print("KERNEL_OK")
</pallas_src>

<mosaic_0001>
module attributes {stable_mosaic.version = 11 : i64} {
  func.func @_mlp_kernel_resident(%arg0: i32, %arg1: memref<16x32xf32, #tpu.memory_space<vmem>>, %arg2: memref<32x64xf32, #tpu.memory_space<vmem>>, %arg3: memref<1x64xf32, #tpu.memory_space<vmem>>, %arg4: memref<64x32xf32, #tpu.memory_space<vmem>>, %arg5: memref<1x32xf32, #tpu.memory_space<vmem>>, %arg6: memref<16x32xf32, #tpu.memory_space<vmem>>) attributes {dimension_semantics = [#tpu.dimension_semantics<parallel>], iteration_bounds = array<i64: 1>, scalar_prefetch = 0 : i64, scratch_operands = 0 : i64, tpu.core_type = #tpu.core_type<tc>, window_params = [{transform_indices = @transform_0, window_bounds = array<i64: 16, 32>}, {pipeline_mode = #tpu.pipeline_mode<synchronous>, transform_indices = @transform_1, window_bounds = array<i64: 32, 64>}, {pipeline_mode = #tpu.pipeline_mode<synchronous>, transform_indices = @transform_2, window_bounds = array<i64: 1, 64>}, {pipeline_mode = #tpu.pipeline_mode<synchronous>, transform_indices = @transform_3, window_bounds = array<i64: 64, 32>}, {pipeline_mode = #tpu.pipeline_mode<synchronous>, transform_indices = @transform_4, window_bounds = array<i64: 1, 32>}, {transform_indices = @transform_5, window_bounds = array<i64: 16, 32>}]} {
    %c0 = arith.constant 0 : index
    %c0_0 = arith.constant 0 : index
    %0 = vector.load %arg1[%c0, %c0_0] : memref<16x32xf32, #tpu.memory_space<vmem>>, vector<16x32xf32>
    %c0_1 = arith.constant 0 : index
    %c0_2 = arith.constant 0 : index
    %1 = vector.load %arg2[%c0_1, %c0_2] : memref<32x64xf32, #tpu.memory_space<vmem>>, vector<32x64xf32>
    %cst = arith.constant dense<0.000000e+00> : vector<16x64xf32>
    %2 = tpu.matmul %0, %1, %cst {dimension_numbers = #tpu.dot_dimension_numbers<[1], [0], [0], [1], [0, 0, 1, 1], [], []>} : vector<16x32xf32>, vector<32x64xf32>, vector<16x64xf32> -> vector<16x64xf32>
    %c0_3 = arith.constant 0 : index
    %c0_4 = arith.constant 0 : index
    %3 = vector.load %arg3[%c0_3, %c0_4] : memref<1x64xf32, #tpu.memory_space<vmem>>, vector<1x64xf32>
    %4 = vector.broadcast %3 : vector<1x64xf32> to vector<16x64xf32>
    %5 = arith.addf %2, %4 : vector<16x64xf32>
    %cst_5 = arith.constant 5.000000e-01 : f32
    %6 = vector.broadcast %cst_5 : f32 to vector<16x64xf32>
    %7 = arith.mulf %6, %5 : vector<16x64xf32>
    %cst_6 = arith.constant 0.707106769 : f32
    %8 = vector.broadcast %cst_6 : f32 to vector<16x64xf32>
    %9 = arith.mulf %5, %8 : vector<16x64xf32>
    %10 = math.erf %9 : vector<16x64xf32>
    %cst_7 = arith.constant 1.000000e+00 : f32
    %11 = vector.broadcast %cst_7 : f32 to vector<16x64xf32>
    %12 = arith.addf %11, %10 : vector<16x64xf32>
    %13 = arith.mulf %7, %12 : vector<16x64xf32>
    %c0_8 = arith.constant 0 : index
    %c0_9 = arith.constant 0 : index
    %14 = vector.load %arg4[%c0_8, %c0_9] : memref<64x32xf32, #tpu.memory_space<vmem>>, vector<64x32xf32>
    %cst_10 = arith.constant dense<0.000000e+00> : vector<16x32xf32>
    %15 = tpu.matmul %13, %14, %cst_10 {dimension_numbers = #tpu.dot_dimension_numbers<[1], [0], [0], [1], [0, 0, 1, 1], [], []>} : vector<16x64xf32>, vector<64x32xf32>, vector<16x32xf32> -> vector<16x32xf32>
    %c0_11 = arith.constant 0 : index
    %c0_12 = arith.constant 0 : index
    %16 = vector.load %arg5[%c0_11, %c0_12] : memref<1x32xf32, #tpu.memory_space<vmem>>, vector<1x32xf32>
    %17 = vector.broadcast %16 : vector<1x32xf32> to vector<16x32xf32>
    %18 = arith.addf %15, %17 : vector<16x32xf32>
    %c0_13 = arith.constant 0 : index
    %c0_14 = arith.constant 0 : index
    %19 = vector.load %arg6[%c0_13, %c0_14] : memref<16x32xf32, #tpu.memory_space<vmem>>, vector<16x32xf32>
    tpu.vector_store %arg6[%c0_13, %c0_14], %18 {strides = array<i32>} : memref<16x32xf32, #tpu.memory_space<vmem>>, vector<16x32xf32>,
    return
  }
  func.func @transform_0(%arg0: i32) -> (i32, i32) {
    %c0_i32 = arith.constant 0 : i32
    %c0_i32_0 = arith.constant 0 : i32
    return %arg0, %c0_i32 : i32, i32
  }
  func.func @transform_1(%arg0: i32) -> (i32, i32) {
    %c0_i32 = arith.constant 0 : i32
    %c0_i32_0 = arith.constant 0 : i32
    %c0_i32_1 = arith.constant 0 : i32
    return %c0_i32, %c0_i32_0 : i32, i32
  }
  func.func @transform_2(%arg0: i32) -> (i32, i32) {
    %c0_i32 = arith.constant 0 : i32
    %c0_i32_0 = arith.constant 0 : i32
    %c0_i32_1 = arith.constant 0 : i32
    return %c0_i32, %c0_i32_0 : i32, i32
  }
  func.func @transform_3(%arg0: i32) -> (i32, i32) {
    %c0_i32 = arith.constant 0 : i32
    %c0_i32_0 = arith.constant 0 : i32
    %c0_i32_1 = arith.constant 0 : i32
    return %c0_i32, %c0_i32_0 : i32, i32
  }
  func.func @transform_4(%arg0: i32) -> (i32, i32) {
    %c0_i32 = arith.constant 0 : i32
    %c0_i32_0 = arith.constant 0 : i32
    %c0_i32_1 = arith.constant 0 : i32
    return %c0_i32, %c0_i32_0 : i32, i32
  }
  func.func @transform_5(%arg0: i32) -> (i32, i32) {
    %c0_i32 = arith.constant 0 : i32
    %c0_i32_0 = arith.constant 0 : i32
    return %arg0, %c0_i32 : i32, i32
  }
}

</mosaic_0001>

<bundles_post_ra>
// kernel: mlp_forward.1
= control target key start
LH: loop header
LB: loop body
LE: loop exit
PB: predicated region body
PF: predicated region fallthrough
CT: control target
= control target key end

     0   :  { %vm34_vm0 = vcmask 261120   ;;  %s410_s0 = inlined_call_operand.vmem [shape: f32[16,32], index: 0, kind: input, shape index: {}]   ;;  %s411_s1 = inlined_call_operand.vmem [shape: f32[32,64], index: 1, kind: input, shape index: {}]   ;;  %s412_s2 = inlined_call_operand.vmem [shape: f32[1,64], index: 2, kind: input, shape index: {}]   ;;  %s413_s3 = inlined_call_operand.vmem [shape: f32[64,32], index: 3, kind: input, shape index: {}]   ;;  %s414_s4 = inlined_call_operand.vmem [shape: f32[1,32], index: 4, kind: input, shape index: {}]   ;;  %s415_s5 = inlined_call_operand.hbm [shape: f32[16,32], index: 5, kind: output, shape index: {}]  }
   0x1   :  { %v26_v0 = vld [vmem:[%s411_s1 + $0x18] sm:$0xff]  ;;  %v25_v1 = vld [vmem:[%s411_s1 + $0x10] sm:$0xff]  ;;  %v21_v2 = vld [vmem:[%s410_s0] sm:$0xff] }
   0x2   :  { %263 = vmatprep.subr.mxu0 %v26_v0  ;;  %v24_v3 = vld [vmem:[%s411_s1 + $0x8] sm:$0xff]  ;;  %271 = vmatprep.mubr.msk.f32.mxu0 %vm34_vm0, %v21_v2 }
   0x3   :  { %264 = vmatpush3.msra.mxu0 %v26_v0 }
   0x4   :  { %10 = vsyncpa [#allocation3], 0  ;;  %265 = vmatprep.subr.mxu0 %v25_v1  ;;  %v23_v4 = vld [vmem:[%s411_s1] sm:$0xff]  ;;  %v22_v5 = vld [vmem:[%s410_s0 + $0x8] sm:$0xff]  ;;  %vm141_vm1 = vcmask 523264   ;;  %s322_s21 = smov [#allocation2]  }
   0x5   :  { %266 = vmatpush3.msra.mxu0 %v25_v1  ;;  %v133_v6 = vld [vmem:[%s413_s3 + $0x38] sm:$0xff]  ;;  %v132_v7 = vld [vmem:[%s413_s3 + $0x30] sm:$0xff]  ;;  %v131_v8 = vld [vmem:[%s413_s3 + $0x28] sm:$0xff]  ;;  %s230_s22 = sshll.u32 %s322_s21, 4  ;;  %s231_s22 = int_to_ptr.vmem [resolvable:$true] %s230_s22 }
   0x6   :  { %267 = vmatprep.subr.mxu0 %v24_v3  ;;  %274 = vmatprep.subr.mxu1 %v133_v6  ;;  %v130_v9 = vld [vmem:[%s413_s3 + $0x20] sm:$0xff]  ;;  %v129_v10 = vld [vmem:[%s413_s3 + $0x18] sm:$0xff]  ;;  %v128_v11 = vld [vmem:[%s413_s3 + $0x10] sm:$0xff]  ;;  %s300_s23 = scalar_lea.vmem %s231_s22, 256  ;;  %p305_p1 = scmp.lt.s32.totalorder %s231_s22, %s231_s22 }
   0x7   :  { %268 = vmatpush3.msra.mxu0 %v24_v3  ;;  %275 = vmatpush3.msra.mxu1 %v133_v6  ;;  %v127_v12 = vld [vmem:[%s413_s3 + $0x8] sm:$0xff]  ;;  %v126_v13 = vld [vmem:[%s413_s3] sm:$0xff]  ;;  %p301_p0 = scmp.ne.s32.totalorder %s231_s22, %s300_s23  ;;  %p306_p2 = scmp.lt.s32.totalorder %s300_s23, %s300_s23 }
   0x8   :  { %269 = vmatprep.subr.mxu0 %v23_v4  ;;  %276 = vmatprep.subr.mxu1 %v132_v7  ;;  %v241_v14 = vld [vmem:[%s412_s2] ss:$0 sm:$0xff] }
   0x9   :  { %270 = vmatpush3.msra.mxu0 %v23_v4  ;;  %277 = vmatpush3.msra.mxu1 %v132_v7  ;;  %v244_v29 = vld [vmem:[%s414_s4] ss:$0 sm:$0xff]  ;;  %p307_p3 = por %p306_p2, %p305_p1 }
   0xa   :  { %272 = vmatmul.mubr.msk.f32.vlgmr.msra.gmra.mxu0 %vm34_vm0, %v22_v5  ;;  %278 = vmatprep.subr.mxu1 %v131_v8 }
   0xb   :  { %279 = vmatpush3.msra.mxu1 %v131_v8  ;;  %p308_p4 = pnand %p307_p3, %p301_p0 }
   0xc   :  { %280 = vmatprep.subr.mxu1 %v130_v9 }
   0xd   :  { %281 = vmatpush3.msra.mxu1 %v130_v9 }
   0xe   :  { %282 = vmatprep.subr.mxu1 %v129_v10 }
   0xf   :  { %283 = vmatpush3.msra.mxu1 %v129_v10 }
  0x10   :  { %284 = vmatprep.subr.mxu1 %v128_v11 }
  0x11   :  { %285 = vmatpush3.msra.mxu1 %v128_v11 }
  0x12   :  { %286 = vmatprep.subr.mxu1 %v127_v12 }
  0x13   :  { %287 = vmatpush3.msra.mxu1 %v127_v12 }
  0x14   :  { %288 = vmatprep.subr.mxu1 %v126_v13 }
  0x15   :  { %289 = vmatpush3.msra.mxu1 %v126_v13 }
  0xca   :  { %v273_v15 = vpop.f32.mrf.mxu0 }
  0xcb   :  { %v113_v16 = vadd.f32 %v273_v15, %v241_v14 }
  0xcc   :  { %v107_v17 = vpop.f32.mrf.mxu0 }
  0xcd   :  { %v119_v18 = vmul.f32 0.70710677, %v113_v16  ;;  %v108_v19 = vadd.f32 %v241_v14, %v107_v17  ;;  %v117_v26 = vmul.f32 0.5, %v113_v16 }
  0xcf   :  { %296 = verf.f32 %v119_v18  ;;  %v118_v20 = vmul.f32 0.70710677, %v108_v19  ;;  %v116_v24 = vmul.f32 0.5, %v108_v19 }
  0xd1   :  { %298 = verf.f32 %v118_v20 }
  0xdc   :  { %v297_v21 = vpop.eup %296 }
  0xdd   :  { %v123_v23 = vadd.f32 1.0, %v297_v21 }
  0xde   :  { %v299_v22 = vpop.eup %298 }
  0xdf   :  { %v122_v25 = vadd.f32 1.0, %v299_v22  ;;  %v125_v28 = vmul.f32 %v123_v23, %v117_v26 }
  0xe1   :  { %v124_v27 = vmul.f32 %v122_v25, %v116_v24 }
  0xe3   :  { %290 = vmatprep.mubr.msk.f32.mxu1 %vm141_vm1, %v124_v27 }
  0xe4   :  { %291 = vmatmul.mubr.msk.f32.vlgmr.msra.gmra.mxu1 %vm141_vm1, %v125_v28 }
 0x1a4   :  { %v292_v30 = vpop.f32.mrf.mxu1 }
 0x1a5   :  { %v220_v31 = vadd.f32 %v292_v30, %v244_v29 }
 0x1a6   :  { %v214_v32 = vpop.f32.mrf.mxu1 }
 0x1a7   :  { %224 = vst.msk [vmem:[#allocation2 + $0x8] sm:$0xff] %vm34_vm0, %v220_v31  ;;  %v215_v33 = vadd.f32 %v244_v29, %v214_v32 }
 0x1a9   :  { %223 = vst.msk [vmem:[#allocation2] sm:$0xff] %vm34_vm0, %v215_v33 }
 0x1aa   :  { %311 = shalt.err (!%p308_p4)
}
 0x1ab   :  { %s323_s24 = smov 128   ;;  %s324_s4 = smov 8  }
 0x1ac   :  { %236 = dma.vmem_to_hbm [thread:$0]  %s231_s22, 256, %s415_s5, [#allocation3], %s323_s24, %s323_s24, %s324_s4  }
 0x1ad   :  { %320 = dma.done.wait [#allocation3], 256  }
 0x1ae   :  { %321 = vsyncadd [#allocation3], 4294967040 }
 0x1af   :  { %240 = vsyncpa [#allocation3], 1 }

</bundles_post_ra>
